<compile_context>
chip_gen: v6e
topology: v6e:2x2x1
jax: 0.10.0
libtpu: 0.0.40
codegen_flags: <defaults>
</compile_context>

<pallas_src>
import functools

import jax
import jax.numpy as jnp
from jax.experimental import pallas as pl
from jax.experimental.pallas import tpu as pltpu


HIDDEN = 128          # feature width
NOISY = 64            # noisy-hidden width per stream (value | advantage)


def _round_up(x, m):
    return ((x + m - 1) // m) * m


# ---------------------------------------------------------------------------
# Pallas kernel: full dueling-Q forward for one batch tile (pure matmul chain).
# ---------------------------------------------------------------------------
def rainbow_q_kernel(
    x_ref,                 # (TB, OBS)           streamed per grid step
    w1_ref, b1_ref,        # (OBS, 128) bf16, (1, 128) f32       resident
    wh_ref, bh_ref,        # (128, 128) bf16, (1, 128) f32  fused wv1||wa1
    whd_ref, bhd_ref,      # (128, A)   bf16, (1, A)   f32  dueling-folded heads
    out_ref,               # (TB, A)             Q values
):
    # feature = ReLU(x @ W1 + b1)                                   (TB, 128)
    x = x_ref[...].astype(jnp.bfloat16)
    h = jnp.dot(x, w1_ref[...], preferred_element_type=jnp.float32) + b1_ref[...]
    h = jnp.maximum(h, 0.0).astype(jnp.bfloat16)

    # fused value|advantage hidden: one (128,128) MXU tile          (TB, 128)
    h2 = jnp.dot(h, wh_ref[...], preferred_element_type=jnp.float32) + bh_ref[...]
    h2 = jnp.maximum(h2, 0.0).astype(jnp.bfloat16)

    # dueling-folded head: Q = h2 @ whd + bhd                       (TB, A)
    q = jnp.dot(h2, whd_ref[...], preferred_element_type=jnp.float32) + bhd_ref[...]
    out_ref[...] = q.astype(out_ref.dtype)


# ---------------------------------------------------------------------------
# One-time parameter fusion (plain JAX glue, hoisted out of the hot path)
# ---------------------------------------------------------------------------
def fuse_params(params, num_actions):
    bf16, f32 = jnp.bfloat16, jnp.float32

    w1 = params["w1"].astype(bf16)
    b1 = params["b1"].astype(f32)

    # value|advantage hidden fused along the output dim -> (128, 128)
    wh = jnp.concatenate([params["wv1"], params["wa1"]], axis=1).astype(bf16)
    bh = jnp.concatenate([params["bv1"], params["ba1"]], axis=1).astype(f32)

    # Fold the dueling combine into the head weights:
    #   Q[:, i] = h2[:, :64] @ wv2 + h2[:, 64:] @ (wa2[:, i] - mean_j wa2[:, j])
    #             + (bv2 + ba2[i] - mean(ba2))
    wa2_c = params["wa2"] - params["wa2"].mean(axis=1, keepdims=True)   # (64, A)
    whd = jnp.concatenate(
        [jnp.broadcast_to(params["wv2"], (NOISY, num_actions)), wa2_c], axis=0
    ).astype(bf16)                                                      # (128, A)
    bhd = (params["bv2"] + params["ba2"]
           - params["ba2"].mean(axis=1, keepdims=True)).astype(f32)     # (1, A)

    return w1, b1, wh, bh, whd, bhd


# ---------------------------------------------------------------------------
# Wrapper
# ---------------------------------------------------------------------------
def rainbow_q_forward(state, fused, num_actions, *, block_b=1024,
                      out_dtype=jnp.float32):
    B, obs_dim = state.shape
    w1, b1, wh, bh, whd, bhd = fused
    assert whd.shape == (HIDDEN, num_actions)

    # Batch tile: large tiles amortize the ~0.35 us/step grid overhead, but cap
    # at ceil(B/2) (8-aligned) so there are >= 2 parallel tiles -> both v7x TCs
    # get work.  Weights (~100 KiB) + double-buffered state/output tiles stay
    # far below the default scoped-VMEM limit even at TB=2048.
    tb_cap = _round_up(B, 8)
    if B > 8:
        tb_cap = min(tb_cap, _round_up(-(-B // 2), 8))
    TB = max(8, min(block_b, tb_cap))
    grid = (pl.cdiv(B, TB),)

    def resident(arr):
        # Constant index_map -> weight stays pinned in VMEM across all grid steps.
        return pl.BlockSpec(arr.shape, lambda i: (0, 0))

    grid_spec = pltpu.PrefetchScalarGridSpec(
        num_scalar_prefetch=0,
        grid=grid,
        in_specs=[
            pl.BlockSpec((TB, obs_dim), lambda i: (i, 0)),   # streamed state tile
            resident(w1), resident(b1),
            resident(wh), resident(bh),
            resident(whd), resident(bhd),
        ],
        out_specs=pl.BlockSpec((TB, num_actions), lambda i: (i, 0)),
    )

    return pl.pallas_call(
        rainbow_q_kernel,
        out_shape=jax.ShapeDtypeStruct((B, num_actions), out_dtype),
        grid_spec=grid_spec,
        compiler_params=pltpu.CompilerParams(
            dimension_semantics=("parallel",),   # shard batch tiles across TCs (v7x)
        ),
    )(state, w1, b1, wh, bh, whd, bhd)


# ---------------------------------------------------------------------------
# Deterministic parameter construction (synthetic, not a checkpoint load)
# ---------------------------------------------------------------------------
def _scaled_noise(key, size):
    # factorized Gaussian noise: f(x) = sign(x) * sqrt(|x|)
    x = jax.random.normal(key, (size,), dtype=jnp.float32)
    return jnp.sign(x) * jnp.sqrt(jnp.abs(x))


def make_params(key, obs_dim, num_actions, hidden=HIDDEN, noisy_hidden=NOISY):
    ks = jax.random.split(key, 16)
    scale = 0.05

    def lin(kw, kb, fan_in, fan_out):
        w = scale * jax.random.normal(kw, (fan_in, fan_out), dtype=jnp.float32)
        b = scale * jax.random.normal(kb, (1, fan_out), dtype=jnp.float32)
        return w, b

    def noisy(kmu_w, kmu_b, keps_in, keps_out, fan_in, fan_out):
        # NoisyLinear: effective W = mu_w + sigma_w * (eps_in outer eps_out),
        #              effective b = mu_b + sigma_b * eps_out
        # TODO(synk): reset_noise() is modeled as re-running this setup glue;
        # the kernel itself always consumes pre-materialized effective weights.
        mu_w = scale * jax.random.normal(kmu_w, (fan_in, fan_out), dtype=jnp.float32)
        mu_b = scale * jax.random.normal(kmu_b, (1, fan_out), dtype=jnp.float32)
        sigma0 = 0.5 / jnp.sqrt(jnp.float32(fan_in))
        sigma_w = jnp.full((fan_in, fan_out), sigma0, dtype=jnp.float32)
        sigma_b = jnp.full((1, fan_out), sigma0, dtype=jnp.float32)
        eps_in = _scaled_noise(keps_in, fan_in)
        eps_out = _scaled_noise(keps_out, fan_out)
        eps_w = eps_in[:, None] * eps_out[None, :]
        return mu_w + sigma_w * eps_w, mu_b + sigma_b * eps_out[None, :]

    w1, b1 = lin(ks[0], ks[1], obs_dim, hidden)
    wv1, bv1 = noisy(ks[2], ks[3], ks[4], ks[5], hidden, noisy_hidden)
    wv2, bv2 = lin(ks[6], ks[7], noisy_hidden, 1)
    wa1, ba1 = noisy(ks[8], ks[9], ks[10], ks[11], hidden, noisy_hidden)
    wa2, ba2 = lin(ks[12], ks[13], noisy_hidden, num_actions)

    return dict(w1=w1, b1=b1, wv1=wv1, bv1=bv1, wv2=wv2, bv2=bv2,
                wa1=wa1, ba1=ba1, wa2=wa2, ba2=ba2)


# ---------------------------------------------------------------------------
# Reference (plain JAX, f32) for sanity check
# ---------------------------------------------------------------------------
def rainbow_q_ref(state, p):
    h = jnp.maximum(state @ p["w1"] + p["b1"], 0.0)
    v = jnp.maximum(h @ p["wv1"] + p["bv1"], 0.0) @ p["wv2"] + p["bv2"]
    a = jnp.maximum(h @ p["wa1"] + p["ba1"], 0.0) @ p["wa2"] + p["ba2"]
    return v + (a - a.mean(axis=1, keepdims=True))


if __name__ == "__main__":
    key = jax.random.PRNGKey(0)
    k_state, k_params = jax.random.split(key)

    B, OBS, A = 16, 16, 4   # small shapes consistent with Linear(obs_shape, 128)
    state = jax.random.normal(k_state, (B, OBS), dtype=jnp.float32)
    params = make_params(k_params, OBS, A)

    # One-time fusion (hoisted out of the forward hot path).
    fused = fuse_params(params, A)

    # TB is capped at ceil(B/2) -> grid=(2,), exercising the batch-tiled,
    # weight-resident, dual-TensorCore pipeline.
    q = rainbow_q_forward(state, fused, A)
    q = jax.block_until_ready(q)

    q_ref = rainbow_q_ref(state, params)
    assert q.shape == (B, A)
    # bf16 matmuls with f32 accumulation vs. f32 reference -> relaxed tolerance.
    assert jnp.allclose(q, q_ref, atol=2e-2, rtol=2e-2)

    print("KERNEL_OK")
</pallas_src>

<mosaic_0001>
module attributes {stable_mosaic.version = 11 : i64} {
  func.func @rainbow_q_kernel(%arg0: i32, %arg1: memref<8x16xf32, #tpu.memory_space<vmem>>, %arg2: memref<16x128xbf16, #tpu.memory_space<vmem>>, %arg3: memref<1x128xf32, #tpu.memory_space<vmem>>, %arg4: memref<128x128xbf16, #tpu.memory_space<vmem>>, %arg5: memref<1x128xf32, #tpu.memory_space<vmem>>, %arg6: memref<128x4xbf16, #tpu.memory_space<vmem>>, %arg7: memref<1x4xf32, #tpu.memory_space<vmem>>, %arg8: memref<8x4xf32, #tpu.memory_space<vmem>>) attributes {dimension_semantics = [#tpu.dimension_semantics<parallel>], iteration_bounds = array<i64: 2>, scalar_prefetch = 0 : i64, scratch_operands = 0 : i64, tpu.core_type = #tpu.core_type<tc>, window_params = [{transform_indices = @transform_0, window_bounds = array<i64: 8, 16>}, {pipeline_mode = #tpu.pipeline_mode<synchronous>, transform_indices = @transform_1, window_bounds = array<i64: 16, 128>}, {pipeline_mode = #tpu.pipeline_mode<synchronous>, transform_indices = @transform_2, window_bounds = array<i64: 1, 128>}, {pipeline_mode = #tpu.pipeline_mode<synchronous>, transform_indices = @transform_3, window_bounds = array<i64: 128, 128>}, {pipeline_mode = #tpu.pipeline_mode<synchronous>, transform_indices = @transform_4, window_bounds = array<i64: 1, 128>}, {pipeline_mode = #tpu.pipeline_mode<synchronous>, transform_indices = @transform_5, window_bounds = array<i64: 128, 4>}, {pipeline_mode = #tpu.pipeline_mode<synchronous>, transform_indices = @transform_6, window_bounds = array<i64: 1, 4>}, {transform_indices = @transform_7, window_bounds = array<i64: 8, 4>}]} {
    %c0 = arith.constant 0 : index
    %c0_0 = arith.constant 0 : index
    %0 = vector.load %arg1[%c0, %c0_0] : memref<8x16xf32, #tpu.memory_space<vmem>>, vector<8x16xf32>
    %1 = arith.truncf %0 : vector<8x16xf32> to vector<8x16xbf16>
    %c0_1 = arith.constant 0 : index
    %c0_2 = arith.constant 0 : index
    %2 = vector.load %arg2[%c0_1, %c0_2] : memref<16x128xbf16, #tpu.memory_space<vmem>>, vector<16x128xbf16>
    %cst = arith.constant dense<0.000000e+00> : vector<8x128xf32>
    %3 = tpu.matmul %1, %2, %cst {dimension_numbers = #tpu.dot_dimension_numbers<[1], [0], [0], [1], [0, 0, 1, 1], [], []>} : vector<8x16xbf16>, vector<16x128xbf16>, vector<8x128xf32> -> vector<8x128xf32>
    %c0_3 = arith.constant 0 : index
    %c0_4 = arith.constant 0 : index
    %4 = vector.load %arg3[%c0_3, %c0_4] : memref<1x128xf32, #tpu.memory_space<vmem>>, vector<1x128xf32>
    %5 = vector.broadcast %4 : vector<1x128xf32> to vector<8x128xf32>
    %6 = arith.addf %3, %5 : vector<8x128xf32>
    %cst_5 = arith.constant 0.000000e+00 : f32
    %7 = vector.broadcast %cst_5 : f32 to vector<8x128xf32>
    %8 = arith.maximumf %6, %7 : vector<8x128xf32>
    %9 = arith.truncf %8 : vector<8x128xf32> to vector<8x128xbf16>
    %c0_6 = arith.constant 0 : index
    %c0_7 = arith.constant 0 : index
    %10 = vector.load %arg4[%c0_6, %c0_7] : memref<128x128xbf16, #tpu.memory_space<vmem>>, vector<128x128xbf16>
    %cst_8 = arith.constant dense<0.000000e+00> : vector<8x128xf32>
    %11 = tpu.matmul %9, %10, %cst_8 {dimension_numbers = #tpu.dot_dimension_numbers<[1], [0], [0], [1], [0, 0, 1, 1], [], []>} : vector<8x128xbf16>, vector<128x128xbf16>, vector<8x128xf32> -> vector<8x128xf32>
    %c0_9 = arith.constant 0 : index
    %c0_10 = arith.constant 0 : index
    %12 = vector.load %arg5[%c0_9, %c0_10] : memref<1x128xf32, #tpu.memory_space<vmem>>, vector<1x128xf32>
    %13 = vector.broadcast %12 : vector<1x128xf32> to vector<8x128xf32>
    %14 = arith.addf %11, %13 : vector<8x128xf32>
    %cst_11 = arith.constant 0.000000e+00 : f32
    %15 = vector.broadcast %cst_11 : f32 to vector<8x128xf32>
    %16 = arith.maximumf %14, %15 : vector<8x128xf32>
    %17 = arith.truncf %16 : vector<8x128xf32> to vector<8x128xbf16>
    %c0_12 = arith.constant 0 : index
    %c0_13 = arith.constant 0 : index
    %18 = vector.load %arg6[%c0_12, %c0_13] : memref<128x4xbf16, #tpu.memory_space<vmem>>, vector<128x4xbf16>
    %cst_14 = arith.constant dense<0.000000e+00> : vector<8x4xf32>
    %19 = tpu.matmul %17, %18, %cst_14 {dimension_numbers = #tpu.dot_dimension_numbers<[1], [0], [0], [1], [0, 0, 1, 1], [], []>} : vector<8x128xbf16>, vector<128x4xbf16>, vector<8x4xf32> -> vector<8x4xf32>
    %c0_15 = arith.constant 0 : index
    %c0_16 = arith.constant 0 : index
    %20 = vector.load %arg7[%c0_15, %c0_16] : memref<1x4xf32, #tpu.memory_space<vmem>>, vector<1x4xf32>
    %21 = vector.broadcast %20 : vector<1x4xf32> to vector<8x4xf32>
    %22 = arith.addf %19, %21 : vector<8x4xf32>
    %c0_17 = arith.constant 0 : index
    %c0_18 = arith.constant 0 : index
    %23 = vector.load %arg8[%c0_17, %c0_18] : memref<8x4xf32, #tpu.memory_space<vmem>>, vector<8x4xf32>
    tpu.vector_store %arg8[%c0_17, %c0_18], %22 {strides = array<i32>} : memref<8x4xf32, #tpu.memory_space<vmem>>, vector<8x4xf32>,
    return
  }
  func.func @transform_0(%arg0: i32) -> (i32, i32) {
    %c0_i32 = arith.constant 0 : i32
    %c0_i32_0 = arith.constant 0 : i32
    return %arg0, %c0_i32 : i32, i32
  }
  func.func @transform_1(%arg0: i32) -> (i32, i32) {
    %c0_i32 = arith.constant 0 : i32
    %c0_i32_0 = arith.constant 0 : i32
    %c0_i32_1 = arith.constant 0 : i32
    return %c0_i32, %c0_i32_0 : i32, i32
  }
  func.func @transform_2(%arg0: i32) -> (i32, i32) {
    %c0_i32 = arith.constant 0 : i32
    %c0_i32_0 = arith.constant 0 : i32
    %c0_i32_1 = arith.constant 0 : i32
    return %c0_i32, %c0_i32_0 : i32, i32
  }
  func.func @transform_3(%arg0: i32) -> (i32, i32) {
    %c0_i32 = arith.constant 0 : i32
    %c0_i32_0 = arith.constant 0 : i32
    %c0_i32_1 = arith.constant 0 : i32
    return %c0_i32, %c0_i32_0 : i32, i32
  }
  func.func @transform_4(%arg0: i32) -> (i32, i32) {
    %c0_i32 = arith.constant 0 : i32
    %c0_i32_0 = arith.constant 0 : i32
    %c0_i32_1 = arith.constant 0 : i32
    return %c0_i32, %c0_i32_0 : i32, i32
  }
  func.func @transform_5(%arg0: i32) -> (i32, i32) {
    %c0_i32 = arith.constant 0 : i32
    %c0_i32_0 = arith.constant 0 : i32
    %c0_i32_1 = arith.constant 0 : i32
    return %c0_i32, %c0_i32_0 : i32, i32
  }
  func.func @transform_6(%arg0: i32) -> (i32, i32) {
    %c0_i32 = arith.constant 0 : i32
    %c0_i32_0 = arith.constant 0 : i32
    %c0_i32_1 = arith.constant 0 : i32
    return %c0_i32, %c0_i32_0 : i32, i32
  }
  func.func @transform_7(%arg0: i32) -> (i32, i32) {
    %c0_i32 = arith.constant 0 : i32
    %c0_i32_0 = arith.constant 0 : i32
    return %arg0, %c0_i32 : i32, i32
  }
}

</mosaic_0001>

<bundles_post_ra>
// kernel: tpu_custom_call.1
= control target key start
LH: loop header
LB: loop body
LE: loop exit
PB: predicated region body
PF: predicated region fallthrough
CT: control target
= control target key end

     0   :  { %12 = vsyncpa [#allocation3], 0  ;;  %s1178_s0 = inlined_call_operand.hbm [shape: f32[16,16], index: 0, kind: input, shape index: {}]   ;;  %s1179_s1 = inlined_call_operand.hbm [shape: bf16[16,128], index: 1, kind: input, shape index: {}]   ;;  %s1180_s2 = inlined_call_operand.vmem [shape: f32[1,128], index: 2, kind: input, shape index: {}]   ;;  %s1181_s3 = inlined_call_operand.vmem [shape: bf16[128,128], index: 3, kind: input, shape index: {}]   ;;  %s1182_s4 = inlined_call_operand.vmem [shape: f32[1,128], index: 4, kind: input, shape index: {}]   ;;  %s1183_s5 = inlined_call_operand.vmem [shape: bf16[128,4], index: 5, kind: input, shape index: {}]   ;;  %s1184_s6 = inlined_call_operand.vmem [shape: f32[1,4], index: 6, kind: input, shape index: {}]   ;;  %s1185_s7 = inlined_call_operand.vmem [shape: f32[16,4], index: 7, kind: output, shape index: {}]  }
   0x1   :  { %14 = vsyncpa [#allocation3 + $0x1], 0 }
   0x2   :  { %15 = vsyncpa [#allocation5], 0  ;;  %s984_s24 = smov 0   ;;  %s986_s25 = smov 0  }
   0x3   :  { %s988_s26 = smov 0   ;;  %s990_s27 = smov 0  }
   0x4 LB: > { %s1003_s28 = sadd.s32 4294967295, %s936_s27   ;;  %p41_p0 = scmp.ne.s32.totalorder %s928_s25, %s924_s24  ;;  %s936_s27 = sphi %s990_s27, %s1200_s27   ;;  %s932_s26 = sphi %s988_s26, %s1199_s26   ;;  %s928_s25 = sphi %s986_s25, %s1198_s25   ;;  %s924_s24 = sphi %s984_s24, %s1197_s24  }
   0x5   : > { %p1186_p1 = scmp.eq.s32.totalorder %s1003_s28, 0  ;;  %p675_p2 = scmp.ge.s32.totalorder %s936_s27, 1 }
   0x6   : > { %p204_p3 = scmp.lt.s32.totalorder %s936_s27, 3  ;;  %s938_s8 = smov [#allocation4]  }
   0x7   : > { %p1011_p4 = por %p1186_p1, %p41_p0  ;;  %s216_s9 = sshll.u32 %s938_s8, 4  ;;  %s217_s9 = int_to_ptr.vmem [resolvable:$true] %s216_s9 }
   0x8   : > { %p1015_p5 = pnand %p675_p2, %p204_p3  ;;  %s1028_s11 = sadd.s32 1, %s936_s27  }
   0x9   : > { %s1189_s29 = scalar_select %p1011_p4, 1, 0 }
   0xa   : > { %s1190_s30 = scalar_select %p1015_p5, 1, 0 }
   0xb   : > { %p779_p6 = pneg %p1015_p5  ;;  %s28_s12 = sadd.s32 1, %s932_s26 }
   0xc   : > { %s25_s13 = ssub.s32 %s936_s27, %s1028_s11  ;;  %s855_s14 = scalar_lea.vmem %s217_s9, 128 }
   0xd   : > { %p1023_p7 = pnand %p779_p6, %p1186_p1  ;;  %p856_p9 = scmp.ne.s32.totalorder %s217_s9, %s855_s14 }
   0xe   : > { %p863_p12 = scmp.lt.s32.totalorder %s217_s9, %s217_s9  ;;  %p864_p13 = scmp.lt.s32.totalorder %s855_s14, %s855_s14 }
   0xf   : > { %p846_p8 = pneg %p1023_p7 }
  0x10   : > { %p865_p0 = por %p864_p13, %p863_p12 }
  0x11   : > { %p858_p10 = pnand %p856_p9, %p846_p8 }
  0x13   : > { %p859_p11 = pneg %p858_p10 }
  0x15   : > { %p866_p2 = pnand %p865_p0, %p859_p11 }
  0x17   : > { %869 = shalt.err (!%p866_p2)
}
  0x18   : > { %s939_s15 = smov 64   ;;  %s940_s16 = smov 4  }
  0x19   : > { %782 = dma.hbm_to_vmem [thread:$0]  (!%p1023_p7), %s1179_s1, 128, %s217_s9, [#allocation5], %s939_s15, %s939_s15, %s940_s16  }
  0x1a   : > { %p26_p3 = scmp.eq.s32.totalorder %s25_s13, 0  ;;  %p35_p6 = scmp.ne.s32.totalorder %s932_s26, %s928_s25 }
  0x1b   : > { %p36_p8 = scmp.eq.s32.totalorder %s936_s27, 0  ;;  %p788_p9 = scmp.lt.s32.totalorder %s936_s27, 2 }
  0x1c   : > { %s1045_s19 = scalar_select %p26_p3, %s932_s26, %s28_s12  }
  0x1d   : > { %p37_p10 = por %p36_p8, %p35_p6  ;;  %s245_s20 = sand.u32 1, %s932_s26  }
  0x1e   : > { %s678_s21 = sshll.u32 %s245_s20, 3  ;;  %s679_s22 = sshll.u32 %s936_s27, 7 }
  0x1f   : > { %s1052_s8 = scalar_lea.hbm %s1178_s0, %s679_s22  ;;  %s249_s10 = scalar_lea.vmem [#allocation2], %s678_s21 }
  0x20   : > { %s256_s9 = sshll.u32 %s249_s10, 4  ;;  %p1054_p7 = pnand %p788_p9, %p37_p10  ;;  %s257_s9 = int_to_ptr.vmem [resolvable:$true] %s256_s9 }
  0x21   : > { %s246_s12 = scalar_lea.sflag [#allocation3], %s245_s20  ;;  %s870_s14 = scalar_lea.hbm %s1052_s8, 128 }
  0x22   : > { %p871_p11 = scmp.ne.s32.totalorder %s1052_s8, %s870_s14  ;;  %p872_p12 = pneg %p1054_p7 }
  0x23   : > { %s875_s16 = scalar_lea.hbm %s1178_s0, 256  ;;  %p876_p2 = scmp.lt.s32.totalorder %s1052_s8, %s1178_s0 }
  0x24   : > { %p873_p13 = pnand %p872_p12, %p871_p11  ;;  %p877_p3 = scmp.lt.s32.totalorder %s875_s16, %s870_s14 }
  0x26   : > { %p874_p0 = pneg %p873_p13  ;;  %p878_p6 = por %p877_p3, %p876_p2 }
  0x28   : > { %p879_p8 = pnand %p878_p6, %p874_p0 }
  0x2a   : > { %882 = shalt.err (!%p879_p8)
}
  0x2b   : > { %s883_s21 = scalar_lea.vmem %s257_s9, 128  ;;  %s941_s20 = smov [#allocation2]  }
  0x2c   : > { %p884_p9 = scmp.ne.s32.totalorder %s257_s9, %s883_s21  ;;  %s888_s22 = sshll.u32 %s941_s20, 4  ;;  %s889_s22 = int_to_ptr.vmem [resolvable:$false] %s888_s22 }
  0x2d   : > { %s890_s23 = scalar_lea.vmem %s889_s22, 256  ;;  %p891_p11 = scmp.lt.s32.totalorder %s257_s9, %s889_s22 }
  0x2e   : > { %p886_p10 = pnand %p884_p9, %p872_p12  ;;  %p892_p13 = scmp.lt.s32.totalorder %s890_s23, %s883_s21 }
  0x30   : > { %p887_p1 = pneg %p886_p10  ;;  %p893_p4 = por %p892_p13, %p891_p11 }
  0x32   : > { %p894_p5 = pnand %p893_p4, %p887_p1 }
  0x34   : > { %897 = shalt.err (!%p894_p5)
}
  0x35   : > { %786 = dma.hbm_to_vmem [thread:$0]  (!%p1054_p7), %s1052_s8, 128, %s257_s9, %s246_s12  }
  0x36   : > { %p1193_p0 = scmp.ne.s32.totalorder %s1190_s30, 0 }
  0x37   : > { %s267_s24 = sand.u32 (!%p1193_p0), 1, %s928_s25   ;;  %p1194_p12 = scmp.ne.s32.totalorder (!%p1193_p0), %s1189_s29, 0 }
  0x38   : > { %265 = sbr.rel (%p1193_p0) target bundleno = 668 (0x29c), region = 48  ;;  %s681_s10 = sshll.u32 (!%p1193_p0), %s267_s24, 3 }
  0x39   : > { %s268_s14 = scalar_lea.sflag (!%p1193_p0), [#allocation3], %s267_s24  ;;  %s271_s27 = scalar_lea.vmem (!%p1193_p0), [#allocation2], %s681_s10 }
  0x3d   : > { %915 = dma.done.wait (%p1194_p12), %s268_s14, 128  }
  0x3e   : > { %917 = vsyncadd (%p1194_p12), %s268_s14, 4294967168  ;;  %p1195_p1 = scmp.eq.s32.totalorder %s1003_s28, 0 }
  0x40   : > { %919 = dma.done.wait (%p1195_p1), [#allocation5], 128   ;;  %p1196_p4 = pmov %p1195_p1 }
  0x41   : > { %v942_v0 = vmov 0.0   ;;  %vm943_vm0 = vmmov 0   ;;  %v827_v1 = vld [vmem:[#allocation4] sm:$0xff]   ;;  %v310_v2 = vld [vmem:[%s271_s27] sm:$0xff]  ;;  %vm327_vm1 = vcmask 130048   ;;  %v828_v4 = vld [vmem:[%s1181_s3 + $0x38] sm:$0xff]  }
  0x42   : > { %921 = vsyncadd (%p1196_p4), [#allocation5], 4294967168  ;;  %727 = vmatprep.subr.bf16.mxu0 %v942_v0  ;;  %729 = vmatprep.mubr.msk.bf16.mxu0 %vm943_vm0, %v942_v0  ;;  %v311_v3 = vpack.c.bf16 %v310_v2, %v310_v2  ;;  %v829_v5 = vld [vmem:[%s1181_s3 + $0x30] sm:$0xff]   ;;  %v830_v6 = vld [vmem:[%s1181_s3 + $0x28] sm:$0xff]   ;;  %p305_p5 = scmp.lt.s32.totalorder %s1003_s28, 1  ;;  %vm597_vm2 = vcmask 31744  }
  0x43   : > { %733 = vmatprep.subr.bf16.mxu1 %v942_v0  ;;  %749 = vmatprep.mubr.msk.bf16.mxu1 %vm943_vm0, %v942_v0  ;;  %v831_v7 = vld [vmem:[%s1181_s3 + $0x20] sm:$0xff]   ;;  %v832_v8 = vld [vmem:[%s1181_s3 + $0x18] sm:$0xff]   ;;  %v833_v9 = vld [vmem:[%s1181_s3 + $0x10] sm:$0xff]  }
  0x44   : > { %728 = vmatpush3.bf16.msra.mxu0 %v827_v1  ;;  %734 = vmatpush3.bf16.msra.mxu1 %v828_v4  ;;  %v834_v10 = vld [vmem:[%s1181_s3 + $0x8] sm:$0xff]   ;;  %v835_v11 = vld [vmem:[%s1181_s3] sm:$0xff]   ;;  %v836_v12 = vld [vmem:[%s1183_s5 + $0x38] sm:$0xff]   ;;  %s1202_s28 = smov (!%p305_p5, %s1003_s28), 1 }
  0x45   : > { %753 = vmatprep.subr.bf16.mxu0 %v942_v0  ;;  %735 = vmatprep.subr.bf16.mxu1 %v942_v0  ;;  %v837_v13 = vld [vmem:[%s1183_s5 + $0x30] sm:$0xff]   ;;  %v838_v14 = vld [vmem:[%s1183_s5 + $0x28] sm:$0xff]   ;;  %v839_v15 = vld [vmem:[%s1183_s5 + $0x20] sm:$0xff]   ;;  %s683_s29 = sshll.u32 %s1202_s28, 3 }
  0x46   : > { %v840_v16 = vld [vmem:[%s1183_s5 + $0x18] sm:$0xff]   ;;  %v841_v17 = vld [vmem:[%s1183_s5 + $0x10] sm:$0xff]   ;;  %v684_v18 = vld [vmem:[%s1180_s2] ss:$0 sm:$0xff]  ;;  %s308_s12 = scalar_lea.vmem %s1185_s7, %s683_s29 }
  0x47   : > { %730 = vmatmul.mubr.msk.bf16.vlgmr.msra.gmra.mxu0 %vm327_vm1, %v311_v3  ;;  %v842_v26 = vld [vmem:[%s1183_s5 + $0x8] sm:$0xff]   ;;  %v843_v27 = vld [vmem:[%s1183_s5] sm:$0xff]  }
  0x48   : > { %769 = vmatprep.mubr.msk.bf16.mxu0 %vm943_vm0, %v942_v0  ;;  %736 = vmatpush3.bf16.msra.mxu1 %v829_v5  ;;  %v687_v28 = vld [vmem:[%s1182_s4] ss:$0 sm:$0xff] }
  0x49   : > { %737 = vmatprep.subr.bf16.mxu1 %v942_v0  ;;  %754 = vmatpush3.bf16.msra.mxu0 %v836_v12  ;;  %v696_v36 = vld [vmem:[%s1184_s6] ss:$0 sm:$0xff] }
  0x4a   : > { %755 = vmatprep.subr.bf16.mxu0 %v942_v0 }
  0x4c   : > { %738 = vmatpush3.bf16.msra.mxu1 %v830_v6 }
  0x4d   : > { %739 = vmatprep.subr.bf16.mxu1 %v942_v0  ;;  %756 = vmatpush3.bf16.msra.mxu0 %v837_v13 }
  0x4e   : > { %757 = vmatprep.subr.bf16.mxu0 %v942_v0 }
  0x50   : > { %740 = vmatpush3.bf16.msra.mxu1 %v831_v7 }
  0x51   : > { %741 = vmatprep.subr.bf16.mxu1 %v942_v0  ;;  %758 = vmatpush3.bf16.msra.mxu0 %v838_v14 }
  0x52   : > { %759 = vmatprep.subr.bf16.mxu0 %v942_v0 }
  0x54   : > { %742 = vmatpush3.bf16.msra.mxu1 %v832_v8 }
  0x55   : > { %743 = vmatprep.subr.bf16.mxu1 %v942_v0  ;;  %760 = vmatpush3.bf16.msra.mxu0 %v839_v15 }
  0x56   : > { %761 = vmatprep.subr.bf16.mxu0 %v942_v0 }
  0x58   : > { %744 = vmatpush3.bf16.msra.mxu1 %v833_v9 }
  0x59   : > { %745 = vmatprep.subr.bf16.mxu1 %v942_v0  ;;  %762 = vmatpush3.bf16.msra.mxu0 %v840_v16 }
  0x5a   : > { %763 = vmatprep.subr.bf16.mxu0 %v942_v0 }
  0x5c   : > { %746 = vmatpush3.bf16.msra.mxu1 %v834_v10 }
  0x5d   : > { %747 = vmatprep.subr.bf16.mxu1 %v942_v0  ;;  %764 = vmatpush3.bf16.msra.mxu0 %v841_v17 }
  0x5e   : > { %765 = vmatprep.subr.bf16.mxu0 %v942_v0 }
  0x60   : > { %748 = vmatpush3.bf16.msra.mxu1 %v835_v11 }
  0x61   : > { %766 = vmatpush3.bf16.msra.mxu0 %v842_v26 }
  0x62   : > { %767 = vmatprep.subr.bf16.mxu0 %v942_v0 }
  0x65   : > { %768 = vmatpush3.bf16.msra.mxu0 %v843_v27 }
 0x107   : > { %v365_v19 = vpop.f32.mrf.mxu0 }
 0x108   : > { %v366_v20 = vadd.f32 %v684_v18, %v365_v19 }
 0x109   : > { %v731_v21 = vpop.f32.mrf.mxu0 }
 0x10a   : > { %v371_v22 = vmax.f32 %v366_v20, 0.0 }
 0x10b   : > { %v368_v23 = vpop.f32.mrf.mxu0 }
 0x10c   : > { %v372_v24 = vpack.c.bf16 %v371_v22, %v371_v22 }
 0x10d   : > { %v732_v25 = vpop.f32.mrf.mxu0 }
 0x10e   : > { %750 = vmatmul.mubr.bf16.vlgmr.msra.gmra.mxu1 %v372_v24 }
 0x1ce   : > { %v478_v29 = vpop.f32.mrf.mxu1 }
 0x1cf   : > { %v479_v30 = vadd.f32 %v687_v28, %v478_v29 }
 0x1d0   : > { %v751_v31 = vpop.f32.mrf.mxu1 }
 0x1d1   : > { %v484_v32 = vmax.f32 %v479_v30, 0.0 }
 0x1d2   : > { %v481_v33 = vpop.f32.mrf.mxu1 }
 0x1d3   : > { %v485_v34 = vpack.c.bf16 %v484_v32, %v484_v32 }
 0x1d4   : > { %v752_v35 = vpop.f32.mrf.mxu1 }
 0x1d5   : > { %770 = vmatmul.mubr.bf16.vlgmr.msra.gmra.mxu0 %v485_v34 }
 0x295   : > { %v591_v37 = vpop.f32.mrf.mxu0 }
 0x296   : > { %v592_v38 = vadd.f32 %v696_v36, %v591_v37 }
 0x297   : > { %v771_v39 = vpop.f32.mrf.mxu0 }
 0x298   : > { %598 = vst.msk [vmem:[%s308_s12] sm:$0xff] %vm597_vm2, %v592_v38 }
 0x299   : > { %v594_v40 = vpop.f32.mrf.mxu0 }
 0x29b   : > { %v772_v41 = vpop.f32.mrf.mxu0 }
 0x29c PF: > { %p18_p7 = scmp.ge.s32.totalorder %s1028_s11, 4   ;;  %s1197_s24 = smov %s928_s25 }
 0x29d   : > { %s1198_s25 = smov %s932_s26  ;;  %s1199_s26 = smov %s1045_s19 }
 0x29e   : > { %s1200_s27 = smov %s1028_s11  ;;  %20 = sbr.rel (!%p18_p7) target bundleno = 4 (0x4), region = 92 }
 0x2a3   :  { %618 = vsyncpa [#allocation3], 1 }
 0x2a4   :  { %620 = vsyncpa [#allocation3 + $0x1], 1 }
 0x2a5   :  { %621 = vsyncpa [#allocation5], 1 }

</bundles_post_ra>
